<compile_context>
chip_gen: v7x
topology: tpu7x:2x2x1
jax: 0.10.0
libtpu: 0.0.40
codegen_flags: <defaults>
</compile_context>

<pallas_src>
import functools

import jax
import jax.numpy as jnp
from jax.experimental import pallas as pl
from jax.experimental.pallas import tpu as pltpu


def _round_up(x, m):
    return (x + m - 1) // m * m


def _conv_kernel(cnt_ref, feats_ref, pos_ref, bid_ref, w_ref, o_ref,
                 *, k, wp, n_pad, out_w_pad):
    # cnt_ref  : SMEM (B,) int32      -- nonzero-point count per batch element.
    # feats_ref: (Cin_pad, N_pad) bf16 -- channel-major point features (zero padded).
    # pos_ref  : (N_pad, 1) int32      -- flattened padded-grid position, -1 for pad slots.
    # bid_ref  : (1, N_pad) int32      -- batch id per point, -1 for pad slots.
    # w_ref    : (Cout, k*k*Cin_pad) bf16, tap-major / cin-minor contraction order.
    # o_ref    : (1, Cout, out_w_pad) f32, out_w_pad = round_up(Ho*Wp, 128).
    b = pl.program_id(0)

    @pl.when(cnt_ref[b] > 0)
    def _():
        # Keep only this batch element's points (zeroed features contribute 0).
        feats = jnp.where(bid_ref[...] == b, feats_ref[...],
                          jnp.zeros((), jnp.bfloat16))          # (Cin_pad, N_pad)
        pos = pos_ref[...]                                      # (N_pad, 1)
        # Lane index of every output column (hoisted out of the tap loop).
        lane = jax.lax.broadcasted_iota(jnp.int32, (n_pad, out_w_pad), 1)

        # Fused scatter + im2col: one one-hot MXU matmul per tap, no dense grid,
        # no shifted slices.  Each part is a full bf16 sublane tile (16 rows),
        # so the concat along the contraction axis is tile-aligned.
        parts = []
        for kh in range(k):
            for kw in range(k):
                off = kh * wp + kw
                hot = ((pos - off) == lane).astype(jnp.bfloat16)  # (N_pad, out_w_pad)
                parts.append(
                    jnp.dot(feats, hot,
                            preferred_element_type=jnp.float32
                            ).astype(jnp.bfloat16))               # (Cin_pad, out_w_pad)
        cols = jnp.concatenate(parts, axis=0)        # (k*k*Cin_pad, out_w_pad)

        # Single fused conv matmul, f32 accumulation, lane-dense store.
        # TODO(synk): v5e-only — repack 4 taps' real channels per 16-row bf16
        # tile so the contraction depth drops from 144 to 48 (<=128, one MXU pass).
        o_ref[0] = jnp.dot(w_ref[...], cols, preferred_element_type=jnp.float32)

    @pl.when(cnt_ref[b] == 0)
    def _():
        # Empty batch element: conv of all-zeros with no bias is zero.
        o_ref[...] = jnp.zeros_like(o_ref)


def sparse_conv_layer(features, coors, batch_size, weight, *, shape, padding):
    """Pallas implementation of SparseConvLayer.forward (densified output).

    features : [N, Cin] float32
    coors    : [N, 3]  int  (batch_idx, y, x)
    weight   : [k, k, Cin, Cout] float32 (HWIO)
    shape    : (H, W) spatial shape of the sparse tensor
    returns  : dense conv output, NCHW [batch_size, Cout, Ho, Wo]
    """
    H, W = shape
    k = weight.shape[0]
    cin = weight.shape[2]
    cout = weight.shape[3]
    pad = padding
    Hp, Wp = H + 2 * pad, W + 2 * pad
    Ho, Wo = Hp - k + 1, Wp - k + 1

    n = features.shape[0]
    cin_p = _round_up(cin, 16)                 # bf16 sublane tile
    n_pad = max(_round_up(n, 8), 8)            # point slots (contraction of scatter matmul)
    out_w = Ho * Wp                            # valid flattened output width
    out_w_pad = _round_up(out_w, 128)          # lane-dense output / matmul N dim

    coors = coors.astype(jnp.int32)
    b_idx = coors[:, 0]
    pos = (coors[:, 1] + pad) * Wp + (coors[:, 2] + pad)

    # Point-level inputs only (tiny, pure layout) -- no dense grid in HBM.
    feats_cm = jnp.zeros((cin_p, n_pad), jnp.bfloat16)
    feats_cm = feats_cm.at[:cin, :n].set(features.astype(jnp.bfloat16).T)
    pos_col = jnp.full((n_pad, 1), -1, jnp.int32).at[:n, 0].set(pos)
    bid_row = jnp.full((1, n_pad), -1, jnp.int32).at[0, :n].set(b_idx)

    # Weight -> (Cout, k*k*Cin_pad), contraction order (kh, kw, cin) matching
    # the kernel's tap concat order.
    w_mat = jnp.transpose(weight, (3, 0, 1, 2))            # (Cout, k, k, Cin)
    w_mat = jnp.pad(w_mat, ((0, 0), (0, 0), (0, 0), (0, cin_p - cin)))
    w_mat = w_mat.reshape(cout, k * k * cin_p).astype(jnp.bfloat16)

    # Per-batch nonzero counts (scalar prefetch) to skip empty batch elements.
    counts = jnp.zeros((batch_size,), jnp.int32).at[b_idx].add(1)

    kernel = functools.partial(_conv_kernel, k=k, wp=Wp, n_pad=n_pad,
                               out_w_pad=out_w_pad)

    # TODO(synk): for large grids / many points add a row-tile grid axis (tile
    # the lane iota range per step) with per-generation VMEM budgets (v7x has
    # 64 MiB vs 128 MiB on v5e/v6e) so the scatter matmul stays VMEM-resident
    # and both v7x TensorCores get >=2 parallel steps.
    out_flat = pl.pallas_call(
        kernel,
        out_shape=jax.ShapeDtypeStruct((batch_size, cout, out_w_pad), jnp.float32),
        grid_spec=pltpu.PrefetchScalarGridSpec(
            num_scalar_prefetch=1,
            grid=(batch_size,),
            in_specs=[
                pl.BlockSpec((cin_p, n_pad), lambda b, cnt: (0, 0)),
                pl.BlockSpec((n_pad, 1), lambda b, cnt: (0, 0)),
                pl.BlockSpec((1, n_pad), lambda b, cnt: (0, 0)),
                pl.BlockSpec((cout, k * k * cin_p), lambda b, cnt: (0, 0)),
            ],
            out_specs=pl.BlockSpec((1, cout, out_w_pad), lambda b, cnt: (b, 0, 0)),
        ),
        compiler_params=pltpu.CompilerParams(
            dimension_semantics=("parallel",)),
    )(counts, feats_cm, pos_col, bid_row, w_mat)

    # (B, Cout, out_w_pad) -> drop lane pad -> (B, Cout, Ho, Wp) -> drop right pad cols.
    out = out_flat[:, :, :out_w].reshape(batch_size, cout, Ho, Wp)[:, :, :, :Wo]
    return out


if __name__ == "__main__":
    # Module config (small, consistent with the forward):
    B = 2
    Cin, Cout = 4, 8
    K = 3
    PAD = 1
    SHAPE = (16, 16)
    N_PTS = 20

    key = jax.random.PRNGKey(0)
    kf, kc, kw = jax.random.split(key, 3)

    # Deterministic "parameter init" for SparseConv2d weight (HWIO), no bias.
    fan_in = Cin * K * K
    weight = (jax.random.normal(kw, (K, K, Cin, Cout), jnp.float32)
              * (1.0 / jnp.sqrt(fan_in)))

    # Deterministic sparse inputs: unique (batch, y, x) coordinates + features.
    H, W = SHAPE
    flat = jax.random.choice(kc, B * H * W, shape=(N_PTS,), replace=False)
    b_idx = flat // (H * W)
    y_idx = (flat % (H * W)) // W
    x_idx = flat % W
    coors = jnp.stack([b_idx, y_idx, x_idx], axis=1).astype(jnp.int32)  # [N, 3]
    features = jax.random.normal(kf, (N_PTS, Cin), jnp.float32)          # [N, Cin]

    out = sparse_conv_layer(features, coors, B, weight, shape=SHAPE, padding=PAD)
    out = jax.block_until_ready(out)

    # Cross-check against XLA's dense conv (same semantics as spconv's dense()).
    x_dense = jnp.zeros((B, H, W, Cin), jnp.float32)
    x_dense = x_dense.at[coors[:, 0], coors[:, 1], coors[:, 2], :].set(features)
    ref = jax.lax.conv_general_dilated(
        x_dense, weight, window_strides=(1, 1),
        padding=[(PAD, PAD), (PAD, PAD)],
        dimension_numbers=("NHWC", "HWIO", "NHWC"))
    ref = jnp.transpose(ref, (0, 3, 1, 2))
    assert out.shape == (B, Cout, H, W), out.shape
    # bf16 matmul (f32 accumulation) vs f32 reference -> loose tolerance.
    assert jnp.allclose(out, ref, atol=3e-2, rtol=3e-2)

    print("KERNEL_OK")
</pallas_src>

<mosaic_0001>
module attributes {stable_mosaic.version = 11 : i64} {
  func.func @_conv_kernel(%arg0: i32, %arg1: memref<2xi32, #tpu.memory_space<smem>>, %arg2: memref<16x24xbf16, #tpu.memory_space<vmem>>, %arg3: memref<24x1xi32, #tpu.memory_space<vmem>>, %arg4: memref<1x24xi32, #tpu.memory_space<vmem>>, %arg5: memref<8x144xbf16, #tpu.memory_space<vmem>>, %arg6: memref<1x8x384xf32, #tpu.memory_space<vmem>>) attributes {dimension_semantics = [#tpu.dimension_semantics<parallel>], iteration_bounds = array<i64: 2>, scalar_prefetch = 1 : i64, scratch_operands = 0 : i64, tpu.core_type = #tpu.core_type<tc>, window_params = [{pipeline_mode = #tpu.pipeline_mode<synchronous>, transform_indices = @transform_0, window_bounds = array<i64: 16, 24>}, {pipeline_mode = #tpu.pipeline_mode<synchronous>, transform_indices = @transform_1, window_bounds = array<i64: 24, 1>}, {pipeline_mode = #tpu.pipeline_mode<synchronous>, transform_indices = @transform_2, window_bounds = array<i64: 1, 24>}, {pipeline_mode = #tpu.pipeline_mode<synchronous>, transform_indices = @transform_3, window_bounds = array<i64: 8, 144>}, {transform_indices = @transform_4, window_bounds = array<i64: 1, 8, 384>}]} {
    %0 = arith.index_cast %arg0 : i32 to index
    %1 = memref.load %arg1[%0] : memref<2xi32, #tpu.memory_space<smem>>
    %c0_i32 = arith.constant 0 : i32
    %2 = arith.cmpi sgt, %1, %c0_i32 : i32
    %3 = arith.extui %2 : i1 to i32
    %c0_i32_0 = arith.constant 0 : i32
    %4 = arith.cmpi ne, %3, %c0_i32_0 : i32
    scf.if %4 {
      %c0 = arith.constant 0 : index
      %c0_3 = arith.constant 0 : index
      %10 = vector.load %arg4[%c0, %c0_3] : memref<1x24xi32, #tpu.memory_space<vmem>>, vector<1x24xi32>
      %11 = vector.broadcast %arg0 : i32 to vector<1x24xi32>
      %12 = arith.cmpi eq, %10, %11 : vector<1x24xi32>
      %c0_4 = arith.constant 0 : index
      %c0_5 = arith.constant 0 : index
      %13 = vector.load %arg2[%c0_4, %c0_5] : memref<16x24xbf16, #tpu.memory_space<vmem>>, vector<16x24xbf16>
      %cst = arith.constant 0.000000e+00 : bf16
      %14 = vector.shape_cast %12 : vector<1x24xi1> to vector<1x24xi1>
      %15 = vector.broadcast %14 : vector<1x24xi1> to vector<16x24xi1>
      %16 = vector.broadcast %cst : bf16 to vector<16x24xbf16>
      %17 = arith.select %15, %13, %16 : vector<16x24xi1>, vector<16x24xbf16>
      %c0_6 = arith.constant 0 : index
      %c0_7 = arith.constant 0 : index
      %18 = vector.load %arg3[%c0_6, %c0_7] : memref<24x1xi32, #tpu.memory_space<vmem>>, vector<24x1xi32>
      %19 = tpu.iota {dimensions = array<i32: 1>} : vector<24x384xi32>
      %c0_i32_8 = arith.constant 0 : i32
      %20 = vector.broadcast %c0_i32_8 : i32 to vector<24x1xi32>
      %21 = arith.subi %18, %20 : vector<24x1xi32>
      %22 = vector.broadcast %21 : vector<24x1xi32> to vector<24x384xi32>
      %23 = arith.cmpi eq, %22, %19 : vector<24x384xi32>
      %24 = arith.extui %23 : vector<24x384xi1> to vector<24x384xi32>
      %25 = arith.sitofp %24 : vector<24x384xi32> to vector<24x384xf32>
      %26 = arith.truncf %25 : vector<24x384xf32> to vector<24x384xbf16>
      %cst_9 = arith.constant dense<0.000000e+00> : vector<16x384xf32>
      %27 = tpu.matmul %17, %26, %cst_9 {dimension_numbers = #tpu.dot_dimension_numbers<[1], [0], [0], [1], [0, 0, 1, 1], [], []>} : vector<16x24xbf16>, vector<24x384xbf16>, vector<16x384xf32> -> vector<16x384xf32>
      %28 = arith.truncf %27 : vector<16x384xf32> to vector<16x384xbf16>
      %c1_i32 = arith.constant 1 : i32
      %29 = vector.broadcast %c1_i32 : i32 to vector<24x1xi32>
      %30 = arith.subi %18, %29 : vector<24x1xi32>
      %31 = vector.broadcast %30 : vector<24x1xi32> to vector<24x384xi32>
      %32 = arith.cmpi eq, %31, %19 : vector<24x384xi32>
      %33 = arith.extui %32 : vector<24x384xi1> to vector<24x384xi32>
      %34 = arith.sitofp %33 : vector<24x384xi32> to vector<24x384xf32>
      %35 = arith.truncf %34 : vector<24x384xf32> to vector<24x384xbf16>
      %cst_10 = arith.constant dense<0.000000e+00> : vector<16x384xf32>
      %36 = tpu.matmul %17, %35, %cst_10 {dimension_numbers = #tpu.dot_dimension_numbers<[1], [0], [0], [1], [0, 0, 1, 1], [], []>} : vector<16x24xbf16>, vector<24x384xbf16>, vector<16x384xf32> -> vector<16x384xf32>
      %37 = arith.truncf %36 : vector<16x384xf32> to vector<16x384xbf16>
      %c2_i32 = arith.constant 2 : i32
      %38 = vector.broadcast %c2_i32 : i32 to vector<24x1xi32>
      %39 = arith.subi %18, %38 : vector<24x1xi32>
      %40 = vector.broadcast %39 : vector<24x1xi32> to vector<24x384xi32>
      %41 = arith.cmpi eq, %40, %19 : vector<24x384xi32>
      %42 = arith.extui %41 : vector<24x384xi1> to vector<24x384xi32>
      %43 = arith.sitofp %42 : vector<24x384xi32> to vector<24x384xf32>
      %44 = arith.truncf %43 : vector<24x384xf32> to vector<24x384xbf16>
      %cst_11 = arith.constant dense<0.000000e+00> : vector<16x384xf32>
      %45 = tpu.matmul %17, %44, %cst_11 {dimension_numbers = #tpu.dot_dimension_numbers<[1], [0], [0], [1], [0, 0, 1, 1], [], []>} : vector<16x24xbf16>, vector<24x384xbf16>, vector<16x384xf32> -> vector<16x384xf32>
      %46 = arith.truncf %45 : vector<16x384xf32> to vector<16x384xbf16>
      %c18_i32 = arith.constant 18 : i32
      %47 = vector.broadcast %c18_i32 : i32 to vector<24x1xi32>
      %48 = arith.subi %18, %47 : vector<24x1xi32>
      %49 = vector.broadcast %48 : vector<24x1xi32> to vector<24x384xi32>
      %50 = arith.cmpi eq, %49, %19 : vector<24x384xi32>
      %51 = arith.extui %50 : vector<24x384xi1> to vector<24x384xi32>
      %52 = arith.sitofp %51 : vector<24x384xi32> to vector<24x384xf32>
      %53 = arith.truncf %52 : vector<24x384xf32> to vector<24x384xbf16>
      %cst_12 = arith.constant dense<0.000000e+00> : vector<16x384xf32>
      %54 = tpu.matmul %17, %53, %cst_12 {dimension_numbers = #tpu.dot_dimension_numbers<[1], [0], [0], [1], [0, 0, 1, 1], [], []>} : vector<16x24xbf16>, vector<24x384xbf16>, vector<16x384xf32> -> vector<16x384xf32>
      %55 = arith.truncf %54 : vector<16x384xf32> to vector<16x384xbf16>
      %c19_i32 = arith.constant 19 : i32
      %56 = vector.broadcast %c19_i32 : i32 to vector<24x1xi32>
      %57 = arith.subi %18, %56 : vector<24x1xi32>
      %58 = vector.broadcast %57 : vector<24x1xi32> to vector<24x384xi32>
      %59 = arith.cmpi eq, %58, %19 : vector<24x384xi32>
      %60 = arith.extui %59 : vector<24x384xi1> to vector<24x384xi32>
      %61 = arith.sitofp %60 : vector<24x384xi32> to vector<24x384xf32>
      %62 = arith.truncf %61 : vector<24x384xf32> to vector<24x384xbf16>
      %cst_13 = arith.constant dense<0.000000e+00> : vector<16x384xf32>
      %63 = tpu.matmul %17, %62, %cst_13 {dimension_numbers = #tpu.dot_dimension_numbers<[1], [0], [0], [1], [0, 0, 1, 1], [], []>} : vector<16x24xbf16>, vector<24x384xbf16>, vector<16x384xf32> -> vector<16x384xf32>
      %64 = arith.truncf %63 : vector<16x384xf32> to vector<16x384xbf16>
      %c20_i32 = arith.constant 20 : i32
      %65 = vector.broadcast %c20_i32 : i32 to vector<24x1xi32>
      %66 = arith.subi %18, %65 : vector<24x1xi32>
      %67 = vector.broadcast %66 : vector<24x1xi32> to vector<24x384xi32>
      %68 = arith.cmpi eq, %67, %19 : vector<24x384xi32>
      %69 = arith.extui %68 : vector<24x384xi1> to vector<24x384xi32>
      %70 = arith.sitofp %69 : vector<24x384xi32> to vector<24x384xf32>
      %71 = arith.truncf %70 : vector<24x384xf32> to vector<24x384xbf16>
      %cst_14 = arith.constant dense<0.000000e+00> : vector<16x384xf32>
      %72 = tpu.matmul %17, %71, %cst_14 {dimension_numbers = #tpu.dot_dimension_numbers<[1], [0], [0], [1], [0, 0, 1, 1], [], []>} : vector<16x24xbf16>, vector<24x384xbf16>, vector<16x384xf32> -> vector<16x384xf32>
      %73 = arith.truncf %72 : vector<16x384xf32> to vector<16x384xbf16>
      %c36_i32 = arith.constant 36 : i32
      %74 = vector.broadcast %c36_i32 : i32 to vector<24x1xi32>
      %75 = arith.subi %18, %74 : vector<24x1xi32>
      %76 = vector.broadcast %75 : vector<24x1xi32> to vector<24x384xi32>
      %77 = arith.cmpi eq, %76, %19 : vector<24x384xi32>
      %78 = arith.extui %77 : vector<24x384xi1> to vector<24x384xi32>
      %79 = arith.sitofp %78 : vector<24x384xi32> to vector<24x384xf32>
      %80 = arith.truncf %79 : vector<24x384xf32> to vector<24x384xbf16>
      %cst_15 = arith.constant dense<0.000000e+00> : vector<16x384xf32>
      %81 = tpu.matmul %17, %80, %cst_15 {dimension_numbers = #tpu.dot_dimension_numbers<[1], [0], [0], [1], [0, 0, 1, 1], [], []>} : vector<16x24xbf16>, vector<24x384xbf16>, vector<16x384xf32> -> vector<16x384xf32>
      %82 = arith.truncf %81 : vector<16x384xf32> to vector<16x384xbf16>
      %c37_i32 = arith.constant 37 : i32
      %83 = vector.broadcast %c37_i32 : i32 to vector<24x1xi32>
      %84 = arith.subi %18, %83 : vector<24x1xi32>
      %85 = vector.broadcast %84 : vector<24x1xi32> to vector<24x384xi32>
      %86 = arith.cmpi eq, %85, %19 : vector<24x384xi32>
      %87 = arith.extui %86 : vector<24x384xi1> to vector<24x384xi32>
      %88 = arith.sitofp %87 : vector<24x384xi32> to vector<24x384xf32>
      %89 = arith.truncf %88 : vector<24x384xf32> to vector<24x384xbf16>
      %cst_16 = arith.constant dense<0.000000e+00> : vector<16x384xf32>
      %90 = tpu.matmul %17, %89, %cst_16 {dimension_numbers = #tpu.dot_dimension_numbers<[1], [0], [0], [1], [0, 0, 1, 1], [], []>} : vector<16x24xbf16>, vector<24x384xbf16>, vector<16x384xf32> -> vector<16x384xf32>
      %91 = arith.truncf %90 : vector<16x384xf32> to vector<16x384xbf16>
      %c38_i32 = arith.constant 38 : i32
      %92 = vector.broadcast %c38_i32 : i32 to vector<24x1xi32>
      %93 = arith.subi %18, %92 : vector<24x1xi32>
      %94 = vector.broadcast %93 : vector<24x1xi32> to vector<24x384xi32>
      %95 = arith.cmpi eq, %94, %19 : vector<24x384xi32>
      %96 = arith.extui %95 : vector<24x384xi1> to vector<24x384xi32>
      %97 = arith.sitofp %96 : vector<24x384xi32> to vector<24x384xf32>
      %98 = arith.truncf %97 : vector<24x384xf32> to vector<24x384xbf16>
      %cst_17 = arith.constant dense<0.000000e+00> : vector<16x384xf32>
      %99 = tpu.matmul %17, %98, %cst_17 {dimension_numbers = #tpu.dot_dimension_numbers<[1], [0], [0], [1], [0, 0, 1, 1], [], []>} : vector<16x24xbf16>, vector<24x384xbf16>, vector<16x384xf32> -> vector<16x384xf32>
      %100 = arith.truncf %99 : vector<16x384xf32> to vector<16x384xbf16>
      %101 = tpu.concatenate %28, %37, %46, %55, %64, %73, %82, %91, %100 in 0 : vector<16x384xbf16>, vector<16x384xbf16>, vector<16x384xbf16>, vector<16x384xbf16>, vector<16x384xbf16>, vector<16x384xbf16>, vector<16x384xbf16>, vector<16x384xbf16>, vector<16x384xbf16> -> vector<144x384xbf16>
      %c0_18 = arith.constant 0 : index
      %c0_19 = arith.constant 0 : index
      %102 = vector.load %arg5[%c0_18, %c0_19] : memref<8x144xbf16, #tpu.memory_space<vmem>>, vector<8x144xbf16>
      %cst_20 = arith.constant dense<0.000000e+00> : vector<8x384xf32>
      %103 = tpu.matmul %102, %101, %cst_20 {dimension_numbers = #tpu.dot_dimension_numbers<[1], [0], [0], [1], [0, 0, 1, 1], [], []>} : vector<8x144xbf16>, vector<144x384xbf16>, vector<8x384xf32> -> vector<8x384xf32>
      %c0_21 = arith.constant 0 : index
      %c0_22 = arith.constant 0 : index
      %c0_23 = arith.constant 0 : index
      %104 = vector.load %arg6[%c0_21, %c0_22, %c0_23] : memref<1x8x384xf32, #tpu.memory_space<vmem>>, vector<1x8x384xf32>
      %105 = vector.shape_cast %104 : vector<1x8x384xf32> to vector<8x384xf32>
      %106 = vector.shape_cast %103 : vector<8x384xf32> to vector<1x8x384xf32>
      tpu.vector_store %arg6[%c0_21, %c0_22, %c0_23], %106 {strides = array<i32>} : memref<1x8x384xf32, #tpu.memory_space<vmem>>, vector<1x8x384xf32>,
    } else {
    }
    %5 = arith.index_cast %arg0 : i32 to index
    %6 = memref.load %arg1[%5] : memref<2xi32, #tpu.memory_space<smem>>
    %c0_i32_1 = arith.constant 0 : i32
    %7 = arith.cmpi eq, %6, %c0_i32_1 : i32
    %8 = arith.extui %7 : i1 to i32
    %c0_i32_2 = arith.constant 0 : i32
    %9 = arith.cmpi ne, %8, %c0_i32_2 : i32
    scf.if %9 {
      %cst = arith.constant 0.000000e+00 : f32
      %10 = vector.broadcast %cst : f32 to vector<1x8x384xf32>
      %c0 = arith.constant 0 : index
      %c0_3 = arith.constant 0 : index
      %c0_4 = arith.constant 0 : index
      %11 = vector.load %arg6[%c0, %c0_3, %c0_4] : memref<1x8x384xf32, #tpu.memory_space<vmem>>, vector<1x8x384xf32>
      tpu.vector_store %arg6[%c0, %c0_3, %c0_4], %10 {strides = array<i32>} : memref<1x8x384xf32, #tpu.memory_space<vmem>>, vector<1x8x384xf32>,
    } else {
    }
    return
  }
  func.func @transform_0(%arg0: i32, %arg1: memref<2xi32, #tpu.memory_space<smem>>) -> (i32, i32) {
    %c0_i32 = arith.constant 0 : i32
    %c0_i32_0 = arith.constant 0 : i32
    %c0_i32_1 = arith.constant 0 : i32
    return %c0_i32, %c0_i32_0 : i32, i32
  }
  func.func @transform_1(%arg0: i32, %arg1: memref<2xi32, #tpu.memory_space<smem>>) -> (i32, i32) {
    %c0_i32 = arith.constant 0 : i32
    %c0_i32_0 = arith.constant 0 : i32
    %c0_i32_1 = arith.constant 0 : i32
    return %c0_i32, %c0_i32_0 : i32, i32
  }
  func.func @transform_2(%arg0: i32, %arg1: memref<2xi32, #tpu.memory_space<smem>>) -> (i32, i32) {
    %c0_i32 = arith.constant 0 : i32
    %c0_i32_0 = arith.constant 0 : i32
    %c0_i32_1 = arith.constant 0 : i32
    return %c0_i32, %c0_i32_0 : i32, i32
  }
  func.func @transform_3(%arg0: i32, %arg1: memref<2xi32, #tpu.memory_space<smem>>) -> (i32, i32) {
    %c0_i32 = arith.constant 0 : i32
    %c0_i32_0 = arith.constant 0 : i32
    %c0_i32_1 = arith.constant 0 : i32
    return %c0_i32, %c0_i32_0 : i32, i32
  }
  func.func @transform_4(%arg0: i32, %arg1: memref<2xi32, #tpu.memory_space<smem>>) -> (i32, i32, i32) {
    %c0_i32 = arith.constant 0 : i32
    %c0_i32_0 = arith.constant 0 : i32
    %c0_i32_1 = arith.constant 0 : i32
    return %arg0, %c0_i32, %c0_i32_0 : i32, i32, i32
  }
}

</mosaic_0001>

<bundles_post_ra>
// kernel: tpu_custom_call.1
= control target key start
LH: loop header
LB: loop body
LE: loop exit
PB: predicated region body
PF: predicated region fallthrough
CT: control target
= control target key end

     0   :  { %s2608_s0 = inlined_call_operand.vmem [shape: s32[2], index: 0, kind: input, shape index: {}]   ;;  %s2609_s1 = inlined_call_operand.vmem [shape: bf16[16,24], index: 1, kind: input, shape index: {}]   ;;  %s2610_s2 = inlined_call_operand.vmem [shape: s32[24,1], index: 2, kind: input, shape index: {}]   ;;  %s2611_s3 = inlined_call_operand.vmem [shape: s32[1,24], index: 3, kind: input, shape index: {}]   ;;  %s2612_s4 = inlined_call_operand.vmem [shape: bf16[8,144], index: 4, kind: input, shape index: {}]   ;;  %s2613_s5 = inlined_call_operand.hbm [shape: f32[2,8,384], index: 5, kind: output, shape index: {}]  }
   0x1   :  { %s10_s20 = sshll.u32 %s2608_s0, 4  ;;  %s11_s20 = int_to_ptr.vmem [resolvable:$true] %s10_s20 }
   0x2   :  { %s2000_s21 = scalar_lea.vmem %s11_s20, 16  ;;  %p2005_p1 = scmp.lt.s32.totalorder %s11_s20, %s11_s20 }
   0x3   :  { %p2001_p0 = scmp.ne.s32.totalorder %s11_s20, %s2000_s21  ;;  %p2006_p2 = scmp.lt.s32.totalorder %s2000_s21, %s2000_s21 }
   0x5   :  { %p2007_p3 = por %p2006_p2, %p2005_p1 }
   0x7   :  { %p2008_p4 = pnand %p2007_p3, %p2001_p0 }
   0x9   :  { %2011 = shalt.err (!%p2008_p4)  }
   0xa   :  { %s2078_s22 = smov [#allocation3]  }
   0xb   :  { %13 = dma.vmem_to_smem %s11_s20, 16, %s2078_s22, [#allocation2] }
   0xc   :  { %2056 = dma.done.wait [#allocation2], 16 }
   0xd   :  { %2057 = vsyncadd [#allocation2], 4294967280 }
   0xe   :  { %15 = sfence }
   0xf   :  { %16 = vsyncpa [#allocation5], 0 }
  0x10   :  { %18 = vsyncpa [#allocation5 + $0x1], 0  ;;  %s2118_s23 = smov 0   ;;  %s2120_s24 = smov 0  }
  0x11   :  { %s2122_s0 = smov 0   ;;  %s2124_s25 = smov 0  }
  0x12 LB: > { %s2139_s26 = sadd.s32 4294967295, %s2076_s25   ;;  %s1651_s27 = sadd.s32 4294967294, %s2076_s25   ;;  %s2076_s25 = sphi %s2124_s25, %s2621_s25   ;;  %s2072_s0 = sphi %s2122_s0, %s2620_s0   ;;  %s2068_s24 = sphi %s2120_s24, %s2619_s24   ;;  %s2064_s23 = sphi %s2118_s23, %s2618_s23  }
  0x13   : > { %s2143_s28 = sadd.s32 1, %s2076_s25   ;;  %s115_s29 = sadd.s32 1, %s2072_s0 }
  0x14   : > { %s112_s30 = ssub.s32 %s2076_s25, %s2143_s28  ;;  %p125_p5 = scmp.ne.s32.totalorder %s2072_s0, %s2068_s24 }
  0x15   : > { %p113_p6 = scmp.eq.s32.totalorder %s112_s30, 0  ;;  %p126_p7 = scmp.eq.s32.totalorder %s2139_s26, 1 }
  0x16   : > { %p131_p8 = scmp.ne.s32.totalorder %s2068_s24, %s2064_s23  ;;  %p132_p9 = scmp.eq.s32.totalorder %s1651_s27, 1 }
  0x17   : > { %s2154_s6 = scalar_select %p113_p6, %s2072_s0, %s115_s29  }
  0x18   : > { %p2156_p10 = por %p126_p7, %p125_p5  ;;  %p2160_p11 = por %p132_p9, %p131_p8 }
  0x19   : > { %p1653_p12 = scmp.ge.s32.totalorder %s2076_s25, 1  ;;  %p162_p13 = scmp.lt.s32.totalorder %s2076_s25, 3 }
  0x1b   : > { %p163_p0 = pnand %p1653_p12, %p162_p13 }
  0x1c   : > { %s180_s9 = sand.u32 (!%p163_p0), 1, %s2068_s24   ;;  %s184_s10 = sld [smem:[#allocation3 + %s2139_s26]] (!%p163_p0) }
  0x1d   : > { %166 = sbr.rel (%p163_p0) target bundleno = 721 (0x2d1), region = 36 }
  0x1e   : > { %s1949_s11 = smul.u32 (!%p163_p0), 24, %s180_s9 }
  0x20   : > { %s2170_s12 = scalar_lea.vmem (!%p163_p0), [#allocation4], %s1949_s11 }
  0x22   : > { %p1654_p1 = scmp.le.s32.totalorder (!%p163_p0), %s184_s10, 0 }
  0x24   : > { %188 = sbr.rel (%p1654_p1) target bundleno = 681 (0x2a9), region = 40  ;;  %v205_v0 = vld [vmem:[%s2610_s2 + $0x10] sm:$0xff] (!%p1654_p1)  ;;  %v203_v1 = vld [vmem:[%s2610_s2] sm:$0xff] (!%p1654_p1)  ;;  %v2079_v2 = vmov (!%p1654_p1), 0   ;;  %v204_v4 = vld [vmem:[%s2610_s2 + $0x8] sm:$0xff] (!%p1654_p1)  ;;  %v2080_v5 = vmov (!%p1654_p1), 0.0   ;;  %v195_v29 = vlaneseq (!%p1654_p1)  ;;  %v190_v31 = vstv (!%p1654_p1), %s2139_s26 }
  0x25   : > { %1997 = vset.pattern.permute.xlu1 (!%p1654_p1), %v2079_v2  ;;  %1996 = vset.pattern.permute.xlu0 (!%p1654_p1), %v2079_v2  ;;  %v1674_v3 = vadd.s32 (!%p1654_p1), 4294967295, %v203_v1  ;;  %v1676_v6 = vadd.s32 (!%p1654_p1), 4294967295, %v205_v0  ;;  %v1675_v7 = vadd.s32 (!%p1654_p1), 4294967295, %v204_v4  ;;  %v1696_v8 = vadd.s32 (!%p1654_p1), 4294967294, %v204_v4  ;;  %v189_v30 = vld [vmem:[%s2611_s3] sm:$0x1] (!%p1654_p1) }
  0x26   : > { %217 = vperm.xlu1 (!%p1654_p1), %1997, %v205_v0   ;;  %211 = vperm.xlu0 (!%p1654_p1), %1996, %v203_v1   ;;  %v1695_v9 = vadd.s32 (!%p1654_p1), 4294967294, %v203_v1  ;;  %v1716_v10 = vadd.s32 (!%p1654_p1), 4294967278, %v203_v1  ;;  %v1697_v11 = vadd.s32 (!%p1654_p1), 4294967294, %v205_v0  ;;  %vm2081_vm0 = vmmov (!%p1654_p1), 0   ;;  %v192_v47 = vld [vmem:[%s2609_s1] sm:$0xf] (!%p1654_p1) }
  0x27   : > { %1877 = vmatprep.subr.bf16.mxu1 (!%p1654_p1), %v2080_v5  ;;  %303 = vmatprep.mubr.bf16.mxu0 (!%p1654_p1), %v2079_v2  ;;  %v1718_v12 = vadd.s32 (!%p1654_p1), 4294967278, %v205_v0  ;;  %v1717_v13 = vadd.s32 (!%p1654_p1), 4294967278, %v204_v4  ;;  %v1738_v14 = vadd.s32 (!%p1654_p1), 4294967277, %v204_v4  ;;  %v1737_v15 = vadd.s32 (!%p1654_p1), 4294967277, %v203_v1  ;;  %v193_v48 = vld [vmem:[%s2609_s1 + $0x4] sm:$0xf] (!%p1654_p1) }
  0x28   : > { %1881 = vmatprep.mubr.msk.bf16.mxu1 (!%p1654_p1), %vm2081_vm0, %v2080_v5  ;;  %v1758_v16 = vadd.s32 (!%p1654_p1), 4294967276, %v203_v1  ;;  %v1739_v17 = vadd.s32 (!%p1654_p1), 4294967277, %v205_v0  ;;  %v1760_v18 = vadd.s32 (!%p1654_p1), 4294967276, %v205_v0  ;;  %v1759_v19 = vadd.s32 (!%p1654_p1), 4294967276, %v204_v4 }
  0x29   : > { %v1780_v20 = vadd.s32 (!%p1654_p1), 4294967260, %v204_v4  ;;  %v1779_v21 = vadd.s32 (!%p1654_p1), 4294967260, %v203_v1  ;;  %v1800_v22 = vadd.s32 (!%p1654_p1), 4294967259, %v203_v1  ;;  %v1781_v23 = vadd.s32 (!%p1654_p1), 4294967260, %v205_v0 }
  0x2a   : > { %362 = vperm.xlu1 (!%p1654_p1), %1997, %v1674_v3   ;;  %214 = vperm.xlu0 (!%p1654_p1), %1996, %v204_v4   ;;  %v1802_v24 = vadd.s32 (!%p1654_p1), 4294967259, %v205_v0  ;;  %v1801_v25 = vadd.s32 (!%p1654_p1), 4294967259, %v204_v4  ;;  %v1822_v26 = vadd.s32 (!%p1654_p1), 4294967258, %v204_v4  ;;  %v1821_v27 = vadd.s32 (!%p1654_p1), 4294967258, %v203_v1 }
  0x2b   : > { %v1823_v28 = vadd.s32 4294967258, %v205_v0  ;;  %v196_v32 = vshrl.u32 %v195_v29, 7  ;;  %vm191_vm1 = vcmp.eq.s32.totalorder %v189_v30, %v190_v31  ;;  %v2191_v34 = vand.u32 127, %v195_v29 }
  0x2c   : > { %v194_v35 = vsel %vm191_vm1, 1, %v2079_v2  ;;  %vm261_vm6 = vcmask 1043456   ;;  %v2082_v52 = vmov 1.0|1.0  }
  0x2d   : > { %v197_v33 = vsub.s32 0, %v196_v32  ;;  %v2195_v37 = vadd.s32 128, %v2191_v34  ;;  %v2198_v38 = vadd.s32 256, %v2191_v34 }
  0x2e   : > { %368 = vperm.xlu1 %1997, %v1676_v6   ;;  %365 = vperm.xlu0 %1996, %v1675_v7  }
  0x2f   : > { %v198_v36 = vrot.slane %v194_v35, %v197_v33 }
  0x31   : > { %vm199_vm5 = vcmp.eq.s32.totalorder %v198_v36, 1 }
  0x32   : > { %506 = vperm.xlu1 %1997, %v1696_v8   ;;  %503 = vperm.xlu0 %1996, %v1695_v9   ;;  %vm2215_vm10 = vmpackc.low %vm199_vm5, %vm199_vm5 }
  0x33   : > { %v201_v55 = vsel %vm2215_vm10, %v192_v47, 0  ;;  %v202_v56 = vsel %vm2215_vm10, %v193_v48, 0 }
  0x34   : > { %v2237_v59 = vcombine.low %v201_v55, %v202_v56 }
  0x36   : > { %644 = vperm.xlu1 %1997, %v1716_v10   ;;  %509 = vperm.xlu0 %1996, %v1697_v11  }
  0x3a   : > { %650 = vperm.xlu1 %1997, %v1718_v12   ;;  %647 = vperm.xlu0 %1996, %v1717_v13  }
  0x3e   : > { %788 = vperm.xlu1 %1997, %v1738_v14   ;;  %785 = vperm.xlu0 %1996, %v1737_v15  }
  0x42   : > { %926 = vperm.xlu1 %1997, %v1758_v16   ;;  %791 = vperm.xlu0 %1996, %v1739_v17  }
  0x46   : > { %932 = vperm.xlu1 %1997, %v1760_v18   ;;  %929 = vperm.xlu0 %1996, %v1759_v19  }
  0x4a   : > { %1070 = vperm.xlu1 %1997, %v1780_v20   ;;  %1067 = vperm.xlu0 %1996, %v1779_v21  }
  0x4e   : > { %1208 = vperm.xlu1 %1997, %v1800_v22   ;;  %1073 = vperm.xlu0 %1996, %v1781_v23  }
  0x52   : > { %1214 = vperm.xlu1 %1997, %v1802_v24   ;;  %1211 = vperm.xlu0 %1996, %v1801_v25  }
  0x56   : > { %1352 = vperm.xlu1 %1997, %v1822_v26   ;;  %1349 = vperm.xlu0 %1996, %v1821_v27  }
  0x5a   : > { %1355 = vperm.xlu0 %1996, %v1823_v28  }
  0xa5   : > { %v218_v39 = vpop.permute.xlu1 %217  ;;  %v212_v40 = vpop.permute.xlu0 %211 }
  0xa6   : > { %vm225_vm2 = vcmp.eq.s32.totalorder %v218_v39, %v2191_v34  ;;  %vm226_vm3 = vcmp.eq.s32.totalorder %v218_v39, %v2195_v37  ;;  %vm227_vm4 = vcmp.eq.s32.totalorder %v218_v39, %v2198_v38  ;;  %vm220_vm7 = vcmp.eq.s32.totalorder %v212_v40, %v2195_v37 }
  0xa7   : > { %v1663_v41 = vsel %vm227_vm4, 1.0, %v2080_v5  ;;  %v1662_v42 = vsel %vm226_vm3, 1.0, %v2080_v5  ;;  %v1661_v43 = vsel %vm225_vm2, 1.0, %v2080_v5  ;;  %vm221_vm9 = vcmp.eq.s32.totalorder %v212_v40, %v2198_v38 }
  0xa8   : > { %v251_v46 = vpack.c.bf16 %v1663_v41, %v1663_v41  ;;  %v250_v50 = vpack.c.bf16 %v1662_v42, %v1662_v42  ;;  %v249_v51 = vpack.c.bf16 %v1661_v43, %v1661_v43  ;;  %vm219_vm15 = vcmp.eq.s32.totalorder %v212_v40, %v2191_v34 }
  0xa9   : > { %v363_v44 = vpop.permute.xlu1 %362  ;;  %v215_v45 = vpop.permute.xlu0 %214 }
  0xaa   : > { %vm223_vm8 = vcmp.eq.s32.totalorder %v215_v45, %v2195_v37  ;;  %vm224_vm12 = vcmp.eq.s32.totalorder %v215_v45, %v2198_v38  ;;  %vm222_vm13 = vcmp.eq.s32.totalorder %v215_v45, %v2191_v34  ;;  %v269_v57 = vsel %vm261_vm6, %v251_v46, 0 }
  0xab   : > { %vm1665_vm11 = vmpackc.low %vm223_vm8, %vm220_vm7  ;;  %v263_v58 = vsel %vm261_vm6, %v249_v51, 0  ;;  %vm371_vm7 = vcmp.eq.s32.totalorder %v363_v44, %v2195_v37 }
  0xac   : > { %1666 = vmatprep.subr.msk.bf16.mxu0 %vm1665_vm11, %v2082_v52  ;;  %vm1671_vm14 = vmpackc.low %vm224_vm12, %vm221_vm9  ;;  %vm257_vm9 = vcmask 195584   ;;  %vm372_vm12 = vcmp.eq.s32.totalorder %v363_v44, %v2198_v38 }
  0xad   : > { %1878 = vmatpush3.bf16.msk.msra.mxu1 %vm1671_vm14, %v2082_v52  ;;  %v369_v53 = vpop.permute.xlu1 %368  ;;  %vm1667_vm1 = vmpackc.low %vm222_vm13, %vm219_vm15  ;;  %v366_v54 = vpop.permute.xlu0 %365  ;;  %vm370_vm13 = vcmp.eq.s32.totalorder %v363_v44, %v2191_v34 }
  0xae   : > { %vm378_vm2 = vcmp.eq.s32.totalorder %v369_v53, %v2198_v38  ;;  %1668 = vmatpush1.bf16.msk.msra.mxu0 %vm1667_vm1, %v2082_v52  ;;  %vm376_vm3 = vcmp.eq.s32.totalorder %v369_v53, %v2191_v34  ;;  %vm377_vm4 = vcmp.eq.s32.totalorder %v369_v53, %v2195_v37  ;;  %vm374_vm5 = vcmp.eq.s32.totalorder %v366_v54, %v2195_v37 }
  0xaf   : > { %1879 = vmatprep.subr.bf16.mxu1 %v2080_v5  ;;  %1669 = vmatprep.subr.msk.bf16.mxu0 %vm261_vm6, %v250_v50  ;;  %v1685_v60 = vsel %vm378_vm2, 1.0, %v2080_v5  ;;  %vm375_vm8 = vcmp.eq.s32.totalorder %v366_v54, %v2198_v38  ;;  %v1683_v63 = vsel %vm376_vm3, 1.0, %v2080_v5  ;;  %v1684_v0 = vsel %vm377_vm4, 1.0, %v2080_v5  ;;  %vm1686_vm11 = vmpackc.low %vm374_vm5, %vm371_vm7 }
  0xb0   : > { %vm373_vm10 = vcmp.eq.s32.totalorder %v366_v54, %v2191_v34  ;;  %v402_v1 = vpack.c.bf16 %v1685_v60, %v1685_v60  ;;  %vm1692_vm14 = vmpackc.low %vm375_vm8, %vm372_vm12  ;;  %v400_v3 = vpack.c.bf16 %v1683_v63, %v1683_v63  ;;  %v401_v4 = vpack.c.bf16 %v1684_v0, %v1684_v0 }
  0xb1   : > { %1880 = vmatpush3.bf16.msra.mxu1 %v269_v57  ;;  %v507_v61 = vpop.permute.xlu1 %506  ;;  %v504_v62 = vpop.permute.xlu0 %503  ;;  %vm1688_vm15 = vmpackc.low %vm373_vm10, %vm370_vm13 }
  0xb2   : > { %274 = vmatpush1.bf16.msra.mxu0 %v263_v58  ;;  %1885 = vmatprep.subr.bf16.mxu1 %v2080_v5  ;;  %vm515_vm1 = vcmp.eq.s32.totalorder %v507_v61, %v2195_v37  ;;  %vm512_vm2 = vcmp.eq.s32.totalorder %v504_v62, %v2195_v37  ;;  %v410_v8 = vsel %vm261_vm6, %v402_v1, 0  ;;  %vm516_vm7 = vcmp.eq.s32.totalorder %v507_v61, %v2198_v38 }
  0xb3   : > { %1687 = vmatprep.subr.msk.bf16.mxu0 %vm1686_vm11, %v2082_v52  ;;  %vm513_vm8 = vcmp.eq.s32.totalorder %v504_v62, %v2198_v38  ;;  %v404_v12 = vsel %vm261_vm6, %v400_v3, 0  ;;  %vm514_vm10 = vcmp.eq.s32.totalorder %v507_v61, %v2191_v34  ;;  %vm511_vm11 = vcmp.eq.s32.totalorder %v504_v62, %v2191_v34  ;;  %vm1707_vm12 = vmpackc.low %vm515_vm1, %vm512_vm2 }
  0xb4   : > { %1882 = vmatmul.mubr.msk.bf16.vlgmr.msra.gmra.mrb[0].mxu1 %vm257_vm9, %v2237_v59  ;;  %vm1713_vm13 = vmpackc.low %vm516_vm7, %vm513_vm8 }
  0xb5   : > { %1670 = vmatmul.mubr.msk.bf16.vlgmr.msra.gmra.mrb[0].mxu0 %vm257_vm9, %v2237_v59  ;;  %1886 = vmatpush3.bf16.msk.msra.mxu1 %vm1692_vm14, %v2082_v52  ;;  %v2258_v6 = vpop.permute.xlu1 %644  ;;  %v510_v7 = vpop.permute.xlu0 %509  ;;  %vm1709_vm14 = vmpackc.low %vm514_vm10, %vm511_vm11 }
  0xb6   : > { %1689 = vmatpush1.bf16.msk.msra.mxu0 %vm1688_vm15, %v2082_v52  ;;  %vm517_vm3 = vcmp.eq.s32.totalorder %v510_v7, %v2191_v34  ;;  %vm518_vm4 = vcmp.eq.s32.totalorder %v510_v7, %v2195_v37  ;;  %vm519_vm5 = vcmp.eq.s32.totalorder %v510_v7, %v2198_v38  ;;  %1887 = vmatprep.subr.bf16.mxu1 %v2080_v5 }
  0xb7   : > { %1690 = vmatprep.subr.msk.bf16.mxu0 %vm261_vm6, %v401_v4  ;;  %444 = vmatprep.mubr.bf16.mxu0 %v2079_v2  ;;  %v1706_v9 = vsel %vm519_vm5, 1.0, %v2080_v5  ;;  %v1704_v13 = vsel %vm517_vm3, 1.0, %v2080_v5  ;;  %v1705_v14 = vsel %vm518_vm4, 1.0, %v2080_v5  ;;  %vm653_vm4 = vcmp.eq.s32.totalorder %v2258_v6, %v2195_v37 }
  0xb8   : > { %1889 = vmatprep.mubr.msk.bf16.mxu1 %vm2081_vm0, %v2080_v5  ;;  %v543_v15 = vpack.c.bf16 %v1706_v9, %v1706_v9  ;;  %v541_v16 = vpack.c.bf16 %v1704_v13, %v1704_v13  ;;  %v542_v17 = vpack.c.bf16 %v1705_v14, %v1705_v14  ;;  %vm654_vm10 = vcmp.eq.s32.totalorder %v2258_v6, %v2198_v38 }
  0xb9   : > { %1888 = vmatpush3.bf16.msra.mxu1 %v410_v8  ;;  %v651_v10 = vpop.permute.xlu1 %650  ;;  %v648_v11 = vpop.permute.xlu0 %647  ;;  %vm652_vm11 = vcmp.eq.s32.totalorder %v2258_v6, %v2191_v34 }
  0xba   : > { %415 = vmatpush1.bf16.msra.mxu0 %v404_v12  ;;  %1893 = vmatprep.subr.bf16.mxu1 %v2080_v5  ;;  %vm660_vm15 = vcmp.eq.s32.totalorder %v651_v10, %v2198_v38  ;;  %vm658_vm1 = vcmp.eq.s32.totalorder %v651_v10, %v2191_v34  ;;  %vm659_vm2 = vcmp.eq.s32.totalorder %v651_v10, %v2195_v37  ;;  %v551_v20 = vsel %vm261_vm6, %v543_v15, 0 }
  0xbb   : > { %1708 = vmatprep.subr.msk.bf16.mxu0 %vm1707_vm12, %v2082_v52  ;;  %vm656_vm3 = vcmp.eq.s32.totalorder %v648_v11, %v2195_v37  ;;  %v1727_v21 = vsel %vm660_vm15, 1.0, %v2080_v5  ;;  %vm657_vm5 = vcmp.eq.s32.totalorder %v648_v11, %v2198_v38  ;;  %v545_v23 = vsel %vm261_vm6, %v541_v16, 0 }
  0xbc   : > { %1890 = vmatmul.mubr.msk.bf16.vlgmr.msra.gmra.mrb[4].mxu1 %vm257_vm9, %v2237_v59  ;;  %v1725_v24 = vsel %vm658_vm1, 1.0, %v2080_v5  ;;  %v1726_v25 = vsel %vm659_vm2, 1.0, %v2080_v5  ;;  %vm655_vm7 = vcmp.eq.s32.totalorder %v648_v11, %v2191_v34  ;;  %vm1728_vm8 = vmpackc.low %vm656_vm3, %vm653_vm4  ;;  %v684_v27 = vpack.c.bf16 %v1727_v21, %v1727_v21 }
  0xbd   : > { %1691 = vmatmul.mubr.msk.bf16.vlgmr.msra.gmra.mrb[4].mxu0 %vm257_vm9, %v2237_v59  ;;  %1894 = vmatpush3.bf16.msk.msra.mxu1 %vm1713_vm13, %v2082_v52  ;;  %v2297_v18 = vpop.permute.xlu1 %788  ;;  %v2299_v19 = vpop.permute.xlu0 %785  ;;  %vm1734_vm12 = vmpackc.low %vm657_vm5, %vm654_vm10  ;;  %v682_v28 = vpack.c.bf16 %v1725_v24, %v1725_v24  ;;  %v683_v29 = vpack.c.bf16 %v1726_v25, %v1726_v25 }
  0xbe   : > { %1710 = vmatpush1.bf16.msk.msra.mxu0 %vm1709_vm14, %v2082_v52  ;;  %1895 = vmatprep.subr.bf16.mxu1 %v2080_v5  ;;  %vm1730_vm13 = vmpackc.low %vm655_vm7, %vm652_vm11  ;;  %vm797_vm14 = vcmp.eq.s32.totalorder %v2297_v18, %v2195_v37  ;;  %vm794_vm1 = vcmp.eq.s32.totalorder %v2299_v19, %v2195_v37  ;;  %v692_v31 = vsel %vm261_vm6, %v684_v27, 0  ;;  %vm798_vm4 = vcmp.eq.s32.totalorder %v2297_v18, %v2198_v38 }
  0xbf   : > { %1711 = vmatprep.subr.msk.bf16.mxu0 %vm261_vm6, %v542_v17  ;;  %585 = vmatprep.mubr.bf16.mxu0 %v2079_v2  ;;  %vm795_vm5 = vcmp.eq.s32.totalorder %v2299_v19, %v2198_v38  ;;  %v686_v35 = vsel %vm261_vm6, %v682_v28, 0  ;;  %vm796_vm7 = vcmp.eq.s32.totalorder %v2297_v18, %v2191_v34  ;;  %vm1749_vm10 = vmpackc.low %vm797_vm14, %vm794_vm1 }
  0xc0   : > { %1897 = vmatprep.mubr.msk.bf16.mxu1 %vm2081_vm0, %v2080_v5  ;;  %vm1755_vm11 = vmpackc.low %vm798_vm4, %vm795_vm5 }
  0xc1   : > { %1896 = vmatpush3.bf16.msra.mxu1 %v551_v20  ;;  %v792_v22 = vpop.permute.xlu0 %791  ;;  %v2324_v26 = vpop.permute.xlu1 %926 }
  0xc2   : > { %556 = vmatpush1.bf16.msra.mxu0 %v545_v23  ;;  %1901 = vmatprep.subr.bf16.mxu1 %v2080_v5  ;;  %vm801_vm15 = vcmp.eq.s32.totalorder %v792_v22, %v2198_v38  ;;  %vm799_vm2 = vcmp.eq.s32.totalorder %v792_v22, %v2191_v34  ;;  %vm800_vm3 = vcmp.eq.s32.totalorder %v792_v22, %v2195_v37 }
  0xc3   : > { %1729 = vmatprep.subr.msk.bf16.mxu0 %vm1728_vm8, %v2082_v52  ;;  %v1748_v32 = vsel %vm801_vm15, 1.0, %v2080_v5  ;;  %vm793_vm8 = vcmp.eq.s32.totalorder %v2299_v19, %v2191_v34  ;;  %v1746_v36 = vsel %vm799_vm2, 1.0, %v2080_v5  ;;  %v1747_v39 = vsel %vm800_vm3, 1.0, %v2080_v5 }
  0xc4   : > { %1898 = vmatmul.mubr.msk.bf16.vlgmr.msra.gmra.mrb[8].mxu1 %vm257_vm9, %v2237_v59  ;;  %v825_v41 = vpack.c.bf16 %v1748_v32, %v1748_v32  ;;  %v823_v42 = vpack.c.bf16 %v1746_v36, %v1746_v36  ;;  %v824_v43 = vpack.c.bf16 %v1747_v39, %v1747_v39  ;;  %vm935_vm2 = vcmp.eq.s32.totalorder %v2324_v26, %v2195_v37 }
  0xc5   : > { %1712 = vmatmul.mubr.msk.bf16.vlgmr.msra.gmra.mrb[8].mxu0 %vm257_vm9, %v2237_v59  ;;  %1902 = vmatpush3.bf16.msk.msra.mxu1 %vm1734_vm12, %v2082_v52  ;;  %v2337_v30 = vpop.permute.xlu0 %929  ;;  %v933_v33 = vpop.permute.xlu1 %932  ;;  %vm1751_vm12 = vmpackc.low %vm796_vm7, %vm793_vm8  ;;  %vm936_vm7 = vcmp.eq.s32.totalorder %v2324_v26, %v2198_v38  ;;  %vm934_vm8 = vcmp.eq.s32.totalorder %v2324_v26, %v2191_v34 }
  0xc6   : > { %1731 = vmatpush1.bf16.msk.msra.mxu0 %vm1730_vm13, %v2082_v52  ;;  %1903 = vmatprep.subr.bf16.mxu1 %v2080_v5  ;;  %vm942_vm13 = vcmp.eq.s32.totalorder %v933_v33, %v2198_v38  ;;  %vm940_vm14 = vcmp.eq.s32.totalorder %v933_v33, %v2191_v34  ;;  %vm941_vm15 = vcmp.eq.s32.totalorder %v933_v33, %v2195_v37  ;;  %v833_v45 = vsel %vm261_vm6, %v825_v41, 0 }
  0xc7   : > { %1732 = vmatprep.subr.msk.bf16.mxu0 %vm261_vm6, %v683_v29  ;;  %726 = vmatprep.mubr.bf16.mxu0 %v2079_v2  ;;  %vm938_vm1 = vcmp.eq.s32.totalorder %v2337_v30, %v2195_v37  ;;  %v1769_v46 = vsel %vm942_vm13, 1.0, %v2080_v5  ;;  %vm939_vm3 = vcmp.eq.s32.totalorder %v2337_v30, %v2198_v38  ;;  %v827_v48 = vsel %vm261_vm6, %v823_v42, 0 }
  0xc8   : > { %1905 = vmatprep.mubr.msk.bf16.mxu1 %vm2081_vm0, %v2080_v5  ;;  %v1767_v49 = vsel %vm940_vm14, 1.0, %v2080_v5  ;;  %v1768_v50 = vsel %vm941_vm15, 1.0, %v2080_v5  ;;  %vm937_vm4 = vcmp.eq.s32.totalorder %v2337_v30, %v2191_v34  ;;  %vm1770_vm5 = vmpackc.low %vm938_vm1, %vm935_vm2  ;;  %v966_v51 = vpack.c.bf16 %v1769_v46, %v1769_v46 }
  0xc9   : > { %1904 = vmatpush3.bf16.msra.mxu1 %v692_v31  ;;  %v2371_v40 = vpop.permute.xlu0 %1067  ;;  %v1071_v44 = vpop.permute.xlu1 %1070  ;;  %v964_v53 = vpack.c.bf16 %v1767_v49, %v1767_v49  ;;  %v965_v54 = vpack.c.bf16 %v1768_v50, %v1768_v50 }
  0xca   : > { %697 = vmatpush1.bf16.msra.mxu0 %v686_v35  ;;  %1909 = vmatprep.subr.bf16.mxu1 %v2080_v5  ;;  %vm1076_vm14 = vcmp.eq.s32.totalorder %v2371_v40, %v2195_v37  ;;  %v974_v57 = vsel %vm261_vm6, %v966_v51, 0  ;;  %vm1080_vm2 = vcmp.eq.s32.totalorder %v1071_v44, %v2198_v38 }
  0xcb   : > { %1750 = vmatprep.subr.msk.bf16.mxu0 %vm1749_vm10, %v2082_v52  ;;  %vm1776_vm10 = vmpackc.low %vm939_vm3, %vm936_vm7  ;;  %vm1077_vm3 = vcmp.eq.s32.totalorder %v2371_v40, %v2198_v38  ;;  %v968_v60 = vsel %vm261_vm6, %v964_v53, 0 }
  0xcc   : > { %1906 = vmatmul.mubr.msk.bf16.vlgmr.msra.gmra.mrb[12].mxu1 %vm257_vm9, %v2237_v59 }
  0xcd   : > { %1733 = vmatmul.mubr.msk.bf16.vlgmr.msra.gmra.mrb[12].mxu0 %vm257_vm9, %v2237_v59  ;;  %1910 = vmatpush3.bf16.msk.msra.mxu1 %vm1755_vm11, %v2082_v52  ;;  %v1074_v47 = vpop.permute.xlu0 %1073  ;;  %vm1772_vm11 = vmpackc.low %vm937_vm4, %vm934_vm8  ;;  %v2419_v55 = vpop.permute.xlu1 %1208  ;;  %vm1078_vm4 = vcmp.eq.s32.totalorder %v1071_v44, %v2191_v34 }
  0xce   : > { %1752 = vmatpush1.bf16.msk.msra.mxu0 %vm1751_vm12, %v2082_v52  ;;  %1911 = vmatprep.subr.bf16.mxu1 %v2080_v5  ;;  %vm1079_vm12 = vcmp.eq.s32.totalorder %v1071_v44, %v2195_v37  ;;  %vm1083_vm13 = vcmp.eq.s32.totalorder %v1074_v47, %v2198_v38  ;;  %vm1081_vm15 = vcmp.eq.s32.totalorder %v1074_v47, %v2191_v34  ;;  %vm1797_vm8 = vmpackc.low %vm1080_vm2, %vm1077_vm3 }
  0xcf   : > { %1753 = vmatprep.subr.msk.bf16.mxu0 %vm261_vm6, %v824_v43  ;;  %867 = vmatprep.mubr.bf16.mxu0 %v2079_v2  ;;  %vm1082_vm1 = vcmp.eq.s32.totalorder %v1074_v47, %v2195_v37  ;;  %v1790_v58 = vsel %vm1083_vm13, 1.0, %v2080_v5  ;;  %v1788_v61 = vsel %vm1081_vm15, 1.0, %v2080_v5  ;;  %vm1791_vm7 = vmpackc.low %vm1079_vm12, %vm1076_vm14  ;;  %vm1217_vm15 = vcmp.eq.s32.totalorder %v2419_v55, %v2195_v37 }
  0xd0   : > { %1913 = vmatprep.mubr.msk.bf16.mxu1 %vm2081_vm0, %v2080_v5  ;;  %v1789_v62 = vsel %vm1082_vm1, 1.0, %v2080_v5  ;;  %v1107_v0 = vpack.c.bf16 %v1790_v58, %v1790_v58  ;;  %v1105_v1 = vpack.c.bf16 %v1788_v61, %v1788_v61 }
  0xd1   : > { %1912 = vmatpush3.bf16.msra.mxu1 %v833_v45  ;;  %v1212_v56 = vpop.permute.xlu0 %1211  ;;  %v1215_v63 = vpop.permute.xlu1 %1214  ;;  %v1106_v3 = vpack.c.bf16 %v1789_v62, %v1789_v62 }
  0xd2   : > { %838 = vmatpush1.bf16.msra.mxu0 %v827_v48  ;;  %1917 = vmatprep.subr.bf16.mxu1 %v2080_v5  ;;  %vm1222_vm12 = vcmp.eq.s32.totalorder %v1215_v63, %v2191_v34  ;;  %vm1223_vm13 = vcmp.eq.s32.totalorder %v1215_v63, %v2195_v37  ;;  %vm1220_vm14 = vcmp.eq.s32.totalorder %v1212_v56, %v2195_v37  ;;  %v1115_v6 = vsel %vm261_vm6, %v1107_v0, 0 }
  0xd3   : > { %1771 = vmatprep.subr.msk.bf16.mxu0 %vm1770_vm5, %v2082_v52  ;;  %vm1075_vm5 = vcmp.eq.s32.totalorder %v2371_v40, %v2191_v34  ;;  %vm1221_vm1 = vcmp.eq.s32.totalorder %v1212_v56, %v2198_v38  ;;  %v1109_v8 = vsel %vm261_vm6, %v1105_v1, 0  ;;  %v1809_v9 = vsel %vm1222_vm12, 1.0, %v2080_v5  ;;  %vm1812_vm3 = vmpackc.low %vm1220_vm14, %vm1217_vm15 }
  0xd4   : > { %1914 = vmatmul.mubr.msk.bf16.vlgmr.msra.gmra.mrb[16].mxu1 %vm257_vm9, %v2237_v59  ;;  %v1810_v10 = vsel %vm1223_vm13, 1.0, %v2080_v5  ;;  %vm1219_vm2 = vcmp.eq.s32.totalorder %v1212_v56, %v2191_v34  ;;  %v1246_v14 = vpack.c.bf16 %v1809_v9, %v1809_v9 }
  0xd5   : > { %1754 = vmatmul.mubr.msk.bf16.vlgmr.msra.gmra.mrb[16].mxu0 %vm257_vm9, %v2237_v59  ;;  %1918 = vmatpush3.bf16.msk.msra.mxu1 %vm1776_vm10, %v2082_v52  ;;  %vm1793_vm10 = vmpackc.low %vm1078_vm4, %vm1075_vm5  ;;  %v2456_v4 = vpop.permute.xlu0 %1349  ;;  %vm1218_vm4 = vcmp.eq.s32.totalorder %v2419_v55, %v2198_v38  ;;  %v1353_v11 = vpop.permute.xlu1 %1352  ;;  %vm1216_vm5 = vcmp.eq.s32.totalorder %v2419_v55, %v2191_v34  ;;  %v1247_v15 = vpack.c.bf16 %v1810_v10, %v1810_v10 }
  0xd6   : > { %1773 = vmatpush1.bf16.msk.msra.mxu0 %vm1772_vm11, %v2082_v52  ;;  %1919 = vmatprep.subr.bf16.mxu1 %v2080_v5  ;;  %vm1224_vm11 = vcmp.eq.s32.totalorder %v1215_v63, %v2198_v38  ;;  %vm1358_vm12 = vcmp.eq.s32.totalorder %v2456_v4, %v2195_v37  ;;  %vm1362_vm15 = vcmp.eq.s32.totalorder %v1353_v11, %v2198_v38  ;;  %v1250_v18 = vsel %vm261_vm6, %v1246_v14, 0 }
  0xd7   : > { %1774 = vmatprep.subr.msk.bf16.mxu0 %vm261_vm6, %v965_v54  ;;  %1008 = vmatprep.mubr.bf16.mxu0 %v2079_v2  ;;  %v1811_v7 = vsel %vm1224_vm11, 1.0, %v2080_v5 }
  0xd8   : > { %1921 = vmatprep.mubr.msk.bf16.mxu1 %vm2081_vm0, %v2080_v5  ;;  %v1248_v13 = vpack.c.bf16 %v1811_v7, %v1811_v7 }
  0xd9   : > { %1920 = vmatpush3.bf16.msra.mxu1 %v974_v57  ;;  %v1356_v12 = vpop.permute.xlu0 %1355 }
  0xda   : > { %979 = vmatpush1.bf16.msra.mxu0 %v968_v60  ;;  %1925 = vmatprep.subr.bf16.mxu1 %v2080_v5  ;;  %vm1365_vm11 = vcmp.eq.s32.totalorder %v1356_v12, %v2198_v38  ;;  %vm1363_vm13 = vcmp.eq.s32.totalorder %v1356_v12, %v2191_v34  ;;  %vm1364_vm14 = vcmp.eq.s32.totalorder %v1356_v12, %v2195_v37  ;;  %v1256_v16 = vsel %vm261_vm6, %v1248_v13, 0 }
  0xdb   : > { %1792 = vmatprep.subr.msk.bf16.mxu0 %vm1791_vm7, %v2082_v52  ;;  %vm1818_vm7 = vmpackc.low %vm1221_vm1, %vm1218_vm4  ;;  %vm1359_vm1 = vcmp.eq.s32.totalorder %v2456_v4, %v2198_v38  ;;  %v1832_v17 = vsel %vm1365_vm11, 1.0, %v2080_v5  ;;  %v1830_v19 = vsel %vm1363_vm13, 1.0, %v2080_v5  ;;  %v1831_v20 = vsel %vm1364_vm14, 1.0, %v2080_v5 }
  0xdc   : > { %1922 = vmatmul.mubr.msk.bf16.vlgmr.msra.gmra.mrb[20].mxu1 %vm257_vm9, %v2237_v59  ;;  %v1389_v38 = vpack.c.bf16 %v1832_v17, %v1832_v17  ;;  %v1388_v21 = vpack.c.bf16 %v1831_v20, %v1831_v20 }
  0xdd   : > { %1775 = vmatmul.mubr.msk.bf16.vlgmr.msra.gmra.mrb[20].mxu0 %vm257_vm9, %v2237_v59  ;;  %1926 = vmatpush3.bf16.msk.msra.mxu1 %vm1797_vm8, %v2082_v52  ;;  %vm1814_vm8 = vmpackc.low %vm1219_vm2, %vm1216_vm5  ;;  %vm1360_vm2 = vcmp.eq.s32.totalorder %v1353_v11, %v2191_v34 }
  0xde   : > { %1794 = vmatpush1.bf16.msk.msra.mxu0 %vm1793_vm10, %v2082_v52  ;;  %1927 = vmatprep.subr.bf16.mxu1 %v2080_v5  ;;  %vm1361_vm10 = vcmp.eq.s32.totalorder %v1353_v11, %v2195_v37  ;;  %vm1839_vm5 = vmpackc.low %vm1362_vm15, %vm1359_vm1  ;;  %v1397_v37 = vsel %vm261_vm6, %v1389_v38, 0 }
  0xdf   : > { %1795 = vmatprep.subr.msk.bf16.mxu0 %vm261_vm6, %v1106_v3  ;;  %1149 = vmatprep.mubr.bf16.mxu0 %v2079_v2  ;;  %vm1833_vm4 = vmpackc.low %vm1361_vm10, %vm1358_vm12 }
  0xe0   : > { %1929 = vmatprep.mubr.msk.bf16.mxu1 %vm2081_vm0, %v2080_v5 }
  0xe1   : > { %1928 = vmatpush3.bf16.msra.mxu1 %v1115_v6 }
  0xe2   : > { %1120 = vmatpush1.bf16.msra.mxu0 %v1109_v8  ;;  %1933 = vmatprep.subr.bf16.mxu1 %v2080_v5 }
  0xe3   : > { %1813 = vmatprep.subr.msk.bf16.mxu0 %vm1812_vm3, %v2082_v52  ;;  %vm1357_vm3 = vcmp.eq.s32.totalorder %v2456_v4, %v2191_v34  ;;  %v1387_v34 = vpack.c.bf16 %v1830_v19, %v1830_v19 }
  0xe4   : > { %1930 = vmatmul.mubr.msk.bf16.vlgmr.msra.gmra.mrb[24].mxu1 %vm257_vm9, %v2237_v59 }
  0xe5   : > { %1796 = vmatmul.mubr.msk.bf16.vlgmr.msra.gmra.mrb[24].mxu0 %vm257_vm9, %v2237_v59  ;;  %1934 = vmatpush3.bf16.msk.msra.mxu1 %vm1818_vm7, %v2082_v52  ;;  %vm1835_vm7 = vmpackc.low %vm1360_vm2, %vm1357_vm3  ;;  %v1391_v22 = vsel %vm261_vm6, %v1387_v34, 0 }
  0xe6   : > { %1815 = vmatpush1.bf16.msk.msra.mxu0 %vm1814_vm8, %v2082_v52  ;;  %1935 = vmatprep.subr.bf16.mxu1 %v2080_v5 }
  0xe7   : > { %1816 = vmatprep.subr.msk.bf16.mxu0 %vm261_vm6, %v1247_v15  ;;  %1290 = vmatprep.mubr.bf16.mxu0 %v2079_v2 }
  0xe8   : > { %1937 = vmatprep.mubr.msk.bf16.mxu1 %vm2081_vm0, %v2080_v5 }
  0xe9   : > { %1936 = vmatpush3.bf16.msra.mxu1 %v1256_v16 }
  0xea   : > { %1261 = vmatpush1.bf16.msra.mxu0 %v1250_v18  ;;  %1941 = vmatprep.subr.bf16.mxu1 %v2080_v5 }
  0xeb   : > { %1834 = vmatprep.subr.msk.bf16.mxu0 %vm1833_vm4, %v2082_v52 }
  0xec   : > { %1938 = vmatmul.mubr.msk.bf16.vlgmr.msra.gmra.mrb[28].mxu1 %vm257_vm9, %v2237_v59 }
  0xed   : > { %1817 = vmatmul.mubr.msk.bf16.vlgmr.msra.gmra.mrb[28].mxu0 %vm257_vm9, %v2237_v59  ;;  %1942 = vmatpush3.bf16.msk.msra.mxu1 %vm1839_vm5, %v2082_v52 }
  0xee   : > { %1836 = vmatpush1.bf16.msk.msra.mxu0 %vm1835_vm7, %v2082_v52  ;;  %1943 = vmatprep.subr.bf16.mxu1 %v2080_v5  ;;  %v2544_v52 = vld [vmem:[%s2612_s4] sm:$0xff] }
  0xef   : > { %1837 = vmatprep.subr.msk.bf16.mxu0 %vm261_vm6, %v1388_v21  ;;  %1431 = vmatprep.mubr.bf16.mxu0 %v2079_v2 }
  0xf0   : > { %1945 = vmatprep.mubr.msk.bf16.mxu1 %vm2081_vm0, %v2080_v5  ;;  %v1843_v5 = vcombine.high %v2544_v52, %v2544_v52  ;;  %vm1493_vm0 = vcmask 130048  }
  0xf1   : > { %1944 = vmatpush3.bf16.msra.mxu1 %v1397_v37 }
  0xf2   : > { %1402 = vmatpush1.bf16.msra.mxu0 %v1391_v22  ;;  %1538 = vmatprep.subr.bf16.mxu1 %v2079_v2 }
  0xf4   : > { %1946 = vmatmul.mubr.msk.bf16.vlgmr.msra.gmra.mrb[32].mxu1 %vm257_vm9, %v2237_v59 }
  0xf5   : > { %1838 = vmatmul.mubr.msk.bf16.vlgmr.msra.gmra.mrb[32].mxu0 %vm257_vm9, %v2237_v59  ;;  %1845 = vmatprep.mubr.msk.bf16.mxu1 %vm1493_vm0, %v1843_v5 }
  0xf6   : > { %1844 = vmatprep.mubr.msk.bf16.mxu0 %vm1493_vm0, %v1843_v5 }
 0x187   : > { %v348_v23 = vpop.f32.mrb[0].mxu1 }
 0x188   : > { %v305_v24 = vpop.f32.mrb[0].mxu0  ;;  %v1883_v25 = vpop.f32.mrb[1].mxu1 }
 0x189   : > { %v307_v26 = vpop.f32.mrb[1].mxu0  ;;  %v351_v27 = vpop.f32.mrb[2].mxu1 }
 0x18a   : > { %v309_v28 = vpop.f32.mrb[2].mxu0  ;;  %v357_v29 = vpack.c.bf16 %v351_v27, %v348_v23  ;;  %v1884_v30 = vpop.f32.mrb[3].mxu1 }
 0x18b   : > { %v355_v59 = vpack.c.bf16 %v309_v28, %v305_v24  ;;  %v311_v31 = vpop.f32.mrb[3].mxu0 }
 0x18c   : > { %v356_v32 = vpack.c.bf16 %v311_v31, %v307_v26  ;;  %1539 = vmatpush1.bf16.msra.mxu1 %v357_v29 }
 0x18d   : > { %1540 = vmatprep.subr.bf16.mxu1 %v2079_v2 }
 0x18e   : > { %1497 = vmatprep.subr.bf16.mxu0 %v356_v32 }
 0x18f   : > { %1498 = vmatpush1.bf16.msra.mxu0 %v355_v59  ;;  %v489_v33 = vpop.f32.mrb[4].mxu1 }
 0x190   : > { %v446_v35 = vpop.f32.mrb[4].mxu0  ;;  %v1891_v36 = vpop.f32.mrb[5].mxu1 }
 0x191   : > { %v448_v39 = vpop.f32.mrb[5].mxu0  ;;  %v492_v40 = vpop.f32.mrb[6].mxu1 }
 0x192   : > { %v450_v41 = vpop.f32.mrb[6].mxu0  ;;  %v498_v42 = vpack.c.bf16 %v492_v40, %v489_v33  ;;  %v1892_v43 = vpop.f32.mrb[7].mxu1 }
 0x193   : > { %v496_v44 = vpack.c.bf16 %v450_v41, %v446_v35  ;;  %v452_v45 = vpop.f32.mrb[7].mxu0 }
 0x194   : > { %v497_v46 = vpack.c.bf16 %v452_v45, %v448_v39  ;;  %1541 = vmatpush1.bf16.msra.mxu1 %v498_v42 }
 0x195   : > { %1542 = vmatprep.subr.bf16.mxu1 %v2079_v2 }
 0x196   : > { %1499 = vmatprep.subr.bf16.mxu0 %v497_v46 }
 0x197   : > { %1500 = vmatpush1.bf16.msra.mxu0 %v496_v44  ;;  %v630_v47 = vpop.f32.mrb[8].mxu1 }
 0x198   : > { %v587_v48 = vpop.f32.mrb[8].mxu0  ;;  %v1899_v49 = vpop.f32.mrb[9].mxu1 }
 0x199   : > { %v589_v50 = vpop.f32.mrb[9].mxu0  ;;  %v633_v51 = vpop.f32.mrb[10].mxu1 }
 0x19a   : > { %v591_v53 = vpop.f32.mrb[10].mxu0  ;;  %v639_v54 = vpack.c.bf16 %v633_v51, %v630_v47  ;;  %v1900_v55 = vpop.f32.mrb[11].mxu1 }
 0x19b   : > { %v637_v56 = vpack.c.bf16 %v591_v53, %v587_v48  ;;  %v593_v57 = vpop.f32.mrb[11].mxu0 }
 0x19c   : > { %v638_v58 = vpack.c.bf16 %v593_v57, %v589_v50  ;;  %1543 = vmatpush1.bf16.msra.mxu1 %v639_v54 }
 0x19d   : > { %1544 = vmatprep.subr.bf16.mxu1 %v2079_v2 }
 0x19e   : > { %1501 = vmatprep.subr.bf16.mxu0 %v638_v58 }
 0x19f   : > { %1502 = vmatpush1.bf16.msra.mxu0 %v637_v56  ;;  %v771_v60 = vpop.f32.mrb[12].mxu1 }
 0x1a0   : > { %v728_v61 = vpop.f32.mrb[12].mxu0  ;;  %v1907_v62 = vpop.f32.mrb[13].mxu1 }
 0x1a1   : > { %v730_v63 = vpop.f32.mrb[13].mxu0  ;;  %v774_v0 = vpop.f32.mrb[14].mxu1 }
 0x1a2   : > { %v732_v1 = vpop.f32.mrb[14].mxu0  ;;  %v780_v3 = vpack.c.bf16 %v774_v0, %v771_v60  ;;  %v1908_v4 = vpop.f32.mrb[15].mxu1 }
 0x1a3   : > { %v778_v6 = vpack.c.bf16 %v732_v1, %v728_v61  ;;  %v734_v7 = vpop.f32.mrb[15].mxu0 }
 0x1a4   : > { %v779_v8 = vpack.c.bf16 %v734_v7, %v730_v63  ;;  %1545 = vmatpush1.bf16.msra.mxu1 %v780_v3  ;;  %v1842_v63 = vcombine.low %v2544_v52, %v2544_v52 }
 0x1a5   : > { %1546 = vmatprep.subr.bf16.mxu1 %v2079_v2 }
 0x1a6   : > { %1503 = vmatprep.subr.bf16.mxu0 %v779_v8 }
 0x1a7   : > { %1504 = vmatpush1.bf16.msra.mxu0 %v778_v6  ;;  %v912_v9 = vpop.f32.mrb[16].mxu1 }
 0x1a8   : > { %v869_v10 = vpop.f32.mrb[16].mxu0  ;;  %v1915_v11 = vpop.f32.mrb[17].mxu1 }
 0x1a9   : > { %v871_v12 = vpop.f32.mrb[17].mxu0  ;;  %v915_v13 = vpop.f32.mrb[18].mxu1 }
 0x1aa   : > { %v873_v14 = vpop.f32.mrb[18].mxu0  ;;  %v921_v15 = vpack.c.bf16 %v915_v13, %v912_v9  ;;  %v1916_v16 = vpop.f32.mrb[19].mxu1 }
 0x1ab   : > { %v919_v17 = vpack.c.bf16 %v873_v14, %v869_v10  ;;  %v875_v18 = vpop.f32.mrb[19].mxu0 }
 0x1ac   : > { %v920_v19 = vpack.c.bf16 %v875_v18, %v871_v12  ;;  %1547 = vmatpush1.bf16.msra.mxu1 %v921_v15 }
 0x1ad   : > { %1548 = vmatprep.subr.bf16.mxu1 %v2079_v2 }
 0x1ae   : > { %1505 = vmatprep.subr.bf16.mxu0 %v920_v19 }
 0x1af   : > { %1506 = vmatpush1.bf16.msra.mxu0 %v919_v17  ;;  %v1053_v20 = vpop.f32.mrb[20].mxu1 }
 0x1b0   : > { %v1010_v38 = vpop.f32.mrb[20].mxu0  ;;  %v1923_v34 = vpop.f32.mrb[21].mxu1 }
 0x1b1   : > { %v1012_v21 = vpop.f32.mrb[21].mxu0  ;;  %v1056_v37 = vpop.f32.mrb[22].mxu1 }
 0x1b2   : > { %v1014_v22 = vpop.f32.mrb[22].mxu0  ;;  %v1062_v5 = vpack.c.bf16 %v1056_v37, %v1053_v20  ;;  %v1924_v23 = vpop.f32.mrb[23].mxu1 }
 0x1b3   : > { %v1060_v24 = vpack.c.bf16 %v1014_v22, %v1010_v38  ;;  %v1016_v25 = vpop.f32.mrb[23].mxu0 }
 0x1b4   : > { %v1061_v26 = vpack.c.bf16 %v1016_v25, %v1012_v21  ;;  %1549 = vmatpush1.bf16.msra.mxu1 %v1062_v5 }
 0x1b5   : > { %1550 = vmatprep.subr.bf16.mxu1 %v2079_v2 }
 0x1b6   : > { %1507 = vmatprep.subr.bf16.mxu0 %v1061_v26 }
 0x1b7   : > { %1508 = vmatpush1.bf16.msra.mxu0 %v1060_v24  ;;  %v1194_v27 = vpop.f32.mrb[24].mxu1 }
 0x1b8   : > { %v1151_v28 = vpop.f32.mrb[24].mxu0  ;;  %v1931_v29 = vpop.f32.mrb[25].mxu1 }
 0x1b9   : > { %v1153_v30 = vpop.f32.mrb[25].mxu0  ;;  %v1197_v59 = vpop.f32.mrb[26].mxu1 }
 0x1ba   : > { %v1155_v31 = vpop.f32.mrb[26].mxu0  ;;  %v1203_v32 = vpack.c.bf16 %v1197_v59, %v1194_v27  ;;  %v1932_v33 = vpop.f32.mrb[27].mxu1 }
 0x1bb   : > { %v1201_v35 = vpack.c.bf16 %v1155_v31, %v1151_v28  ;;  %v1157_v36 = vpop.f32.mrb[27].mxu0 }
 0x1bc   : > { %v1202_v39 = vpack.c.bf16 %v1157_v36, %v1153_v30  ;;  %1551 = vmatpush1.bf16.msra.mxu1 %v1203_v32 }
 0x1bd   : > { %1552 = vmatprep.subr.bf16.mxu1 %v2079_v2 }
 0x1be   : > { %1509 = vmatprep.subr.bf16.mxu0 %v1202_v39 }
 0x1bf   : > { %1510 = vmatpush1.bf16.msra.mxu0 %v1201_v35  ;;  %v1335_v40 = vpop.f32.mrb[28].mxu1 }
 0x1c0   : > { %v1292_v41 = vpop.f32.mrb[28].mxu0  ;;  %v1939_v42 = vpop.f32.mrb[29].mxu1 }
 0x1c1   : > { %v1294_v43 = vpop.f32.mrb[29].mxu0  ;;  %v1338_v44 = vpop.f32.mrb[30].mxu1 }
 0x1c2   : > { %v1296_v45 = vpop.f32.mrb[30].mxu0  ;;  %v1344_v46 = vpack.c.bf16 %v1338_v44, %v1335_v40  ;;  %v1940_v47 = vpop.f32.mrb[31].mxu1 }
 0x1c3   : > { %v1342_v48 = vpack.c.bf16 %v1296_v45, %v1292_v41  ;;  %v1298_v49 = vpop.f32.mrb[31].mxu0 }
 0x1c4   : > { %v1343_v50 = vpack.c.bf16 %v1298_v49, %v1294_v43  ;;  %1553 = vmatpush1.bf16.msra.mxu1 %v1344_v46 }
 0x1c5   : > { %1554 = vmatprep.subr.bf16.mxu1 %v2079_v2 }
 0x1c6   : > { %1511 = vmatprep.subr.bf16.mxu0 %v1343_v50 }
 0x1c7   : > { %1512 = vmatpush1.bf16.msra.mxu0 %v1342_v48  ;;  %v1476_v51 = vpop.f32.mrb[32].mxu1 }
 0x1c8   : > { %v1433_v53 = vpop.f32.mrb[32].mxu0  ;;  %v1947_v54 = vpop.f32.mrb[33].mxu1 }
 0x1c9   : > { %v1435_v55 = vpop.f32.mrb[33].mxu0  ;;  %v1479_v56 = vpop.f32.mrb[34].mxu1 }
 0x1ca   : > { %v1437_v57 = vpop.f32.mrb[34].mxu0  ;;  %v1485_v58 = vpack.c.bf16 %v1479_v56, %v1476_v51  ;;  %v1948_v60 = vpop.f32.mrb[35].mxu1 }
 0x1cb   : > { %v1483_v61 = vpack.c.bf16 %v1437_v57, %v1433_v53  ;;  %v1439_v62 = vpop.f32.mrb[35].mxu0 }
 0x1cc   : > { %v1484_v0 = vpack.c.bf16 %v1439_v62, %v1435_v55  ;;  %1555 = vmatpush1.bf16.msra.mxu1 %v1485_v58 }
 0x1ce   : > { %1513 = vmatprep.subr.bf16.mxu0 %v1484_v0 }
 0x1cf   : > { %1514 = vmatpush1.bf16.msra.mxu0 %v1483_v61  ;;  %1571 = vmatmul.mubr.bf16.vlgmr.msra.gmra.mrb[36].mxu1 %v1842_v63 }
 0x1d2   : > { %1530 = vmatmul.mubr.bf16.vlgmr.msra.gmra.mrb[36].mxu0 %v1842_v63 }
 0x2a2   : > { %v1572_v2 = vpop.f32.mrb[36].mxu1 }
 0x2a3   : > { %1580 = vst [vmem:[%s2170_s12 + $0x10] sm:$0xff] %v1572_v2  ;;  %v1574_v1 = vpop.f32.mrb[37].mxu1 }
 0x2a4   : > { %v1575_v3 = vpop.f32.mrb[38].mxu1 }
 0x2a5   : > { %v1531_v4 = vpop.f32.mrb[36].mxu0  ;;  %v1576_v6 = vpop.f32.mrb[39].mxu1 }
 0x2a6   : > { %1578 = vst [vmem:[%s2170_s12] sm:$0xff] %v1531_v4  ;;  %v1533_v7 = vpop.f32.mrb[37].mxu0 }
 0x2a7   : > { %1579 = vst [vmem:[%s2170_s12 + $0x8] sm:$0xff] %v1533_v7  ;;  %v1535_v8 = vpop.f32.mrb[38].mxu0 }
 0x2a8   : > { %v1536_v9 = vpop.f32.mrb[39].mxu0 }
 0x2a9 PF: > { %s1581_s11 = sld [smem:[#allocation3 + %s2139_s26]] }
 0x2af   : > { %p1846_p2 = scmp.ne.s32.totalorder %s1581_s11, 0 }
 0x2b0   : > { %v2083_v52 = vmov (!%p1846_p2), 0.0  }
 0x2b1   : > { %1585 = sbr.rel (%p1846_p2) target bundleno = 696 (0x2b8), region = 44  ;;  %1586 = vst [vmem:[%s2170_s12] sm:$0xff] (!%p1846_p2), %v2083_v52  ;;  %1587 = vst [vmem:[%s2170_s12 + $0x8] sm:$0xff] (!%p1846_p2), %v2083_v52 }
 0x2b2   : > { %1588 = vst [vmem:[%s2170_s12 + $0x10] sm:$0xff] (!%p1846_p2), %v2083_v52 }
 0x2b8 PF: > { %s1950_s13 = smul.u32 384, %s2139_s26  ;;  %s1604_s14 = sshll.u32 %s2170_s12, 4  ;;  %s1605_s14 = int_to_ptr.vmem [resolvable:$true] %s1604_s14 }
 0x2b9   : > { %s1590_s18 = scalar_lea.sflag [#allocation5], %s180_s9  ;;  %s2012_s19 = scalar_lea.vmem %s1605_s14, 384 }
 0x2ba   : > { %s2570_s17 = scalar_lea.hbm %s2613_s5, %s1950_s13  ;;  %p2013_p3 = scmp.ne.s32.totalorder %s1605_s14, %s2012_s19 }
 0x2bb   : > { %s2084_s20 = smov [#allocation4]  }
 0x2bc   : > { %p2014_p4 = pnand %p2013_p3, %p2156_p10  ;;  %s2016_s21 = sshll.u32 %s2084_s20, 4  ;;  %s2017_s21 = int_to_ptr.vmem [resolvable:$false] %s2016_s21 }
 0x2bd   : > { %s2018_s22 = scalar_lea.vmem %s2017_s21, 768  ;;  %p2019_p6 = scmp.lt.s32.totalorder %s1605_s14, %s2017_s21 }
 0x2be   : > { %p2015_p5 = pneg %p2014_p4  ;;  %p2020_p7 = scmp.lt.s32.totalorder %s2018_s22, %s2012_s19 }
 0x2c0   : > { %p2021_p8 = por %p2020_p7, %p2019_p6 }
 0x2c2   : > { %p2022_p9 = pnand %p2021_p8, %p2015_p5 }
 0x2c4   : > { %2025 = shalt.err (!%p2022_p9)
}
 0x2c5   : > { %s2026_s26 = scalar_lea.hbm %s2570_s17, 384  ;;  %s2030_s27 = scalar_lea.hbm %s2613_s5, 768 }
 0x2c6   : > { %p2027_p12 = scmp.ne.s32.totalorder %s2570_s17, %s2026_s26  ;;  %p2031_p1 = scmp.lt.u32.totalorder %s2570_s17, %s2613_s5 }
 0x2c7   : > { %p2032_p2 = scmp.lt.u32.totalorder %s2030_s27, %s2026_s26  ;;  %p2034_p4 = scmp.lt.u32.totalorder %s2026_s26, %s2570_s17 }
 0x2c8   : > { %p2028_p13 = pnand %p2027_p12, %p2156_p10 }
 0x2c9   : > { %p2033_p3 = por %p2032_p2, %p2031_p1 }
 0x2ca   : > { %p2029_p0 = pneg %p2028_p13 }
 0x2cb   : > { %p2035_p5 = por %p2034_p4, %p2033_p3 }
 0x2cd   : > { %p2036_p6 = pnand %p2035_p5, %p2029_p0 }
 0x2cf   : > { %2039 = shalt.err (!%p2036_p6)
}
 0x2d0   : > { %1951 = dma.vmem_to_hbm [thread:$0]  (%p2156_p10), %s1605_s14, 384, %s2570_s17, %s1590_s18  }
 0x2d1 PF: > { %p1957_p7 = scmp.ge.s32.totalorder %s2076_s25, 2  ;;  %s1616_s10 = sand.u32 1, %s2064_s23  }
 0x2d2   : > { %s1617_s11 = scalar_lea.sflag [#allocation5], %s1616_s10 }
 0x2d3   : > { %p1954_p8 = pnand %p1957_p7, %p2160_p11 }
 0x2d5   : > { %2059 = dma.done.wait (!%p1954_p8), %s1617_s11, 384  }
 0x2d6   : > { %2061 = vsyncadd (!%p1954_p8), %s1617_s11, 4294966912  ;;  %p21_p9 = scmp.ge.s32.totalorder %s2143_s28, 4   ;;  %s2618_s23 = smov %s2068_s24 }
 0x2d7   : > { %s2619_s24 = smov %s2072_s0  ;;  %s2620_s0 = smov %s2154_s6 }
 0x2d8   : > { %s2621_s25 = smov %s2143_s28  ;;  %23 = sbr.rel (!%p21_p9) target bundleno = 18 (0x12), region = 76 }
 0x2df   :  { %1622 = vsyncpa [#allocation5], 1 }
 0x2e0   :  { %1624 = vsyncpa [#allocation5 + $0x1], 1 }

</bundles_post_ra>
